<compile_context>
chip_gen: v5e
topology: v5e:2x2
jax: 0.10.0
libtpu: 0.0.40
codegen_flags: <defaults>
</compile_context>

<pallas_src>
import functools
import math

import jax
import jax.numpy as jnp
from jax import lax
from jax.experimental import pallas as pl
from jax.experimental.pallas import tpu as pltpu


# ----------------------------------------------------------------------------
# Generation-aware VMEM budgets
# ----------------------------------------------------------------------------
def _vmem_capacity_bytes():
    try:
        info = pltpu.get_tpu_info()
        cap = getattr(info, "vmem_capacity_bytes", None)
        if cap:
            return int(cap)
    except Exception:
        pass
    return 64 * 1024 * 1024  # conservative: v7x per-TC physical VMEM


_VMEM_CAP = max(_vmem_capacity_bytes(), 32 * 1024 * 1024)
# v5e/v6e (128 MiB): 96 / 80 MiB.  v7x (64 MiB/TC): 48 / 40 MiB.
_LINEAR_VMEM_LIMIT = min(int(_VMEM_CAP * 0.75), 96 * 1024 * 1024)
_ATTN_VMEM_LIMIT = min(int(_VMEM_CAP * 0.625), 80 * 1024 * 1024)


def _pick_tile(dim, target, align):
    """Largest tile <= target that is a multiple of `align` and divides `dim`.

    Falls back to the full dimension (block == array dim is always legal
    w.r.t. the (8, 128) constraint)."""
    if dim <= target:
        return dim
    t = (min(target, dim) // align) * align
    while t >= align:
        if dim % t == 0:
            return t
        t -= align
    return dim


def _linear_tiles(M, K, Nout, out_itemsize, budget):
    """Pick (tm, tn, tk): big tiles (target 512/512, tk full-K or 1024) that
    fit the VMEM budget; fall back to smaller candidates if needed."""
    cand = ((512, 512, 2048), (512, 512, 1024), (256, 512, 1024),
            (256, 256, 1024), (128, 256, 512), (128, 128, 512))
    tm = tn = tk = None
    for mt, nt, kt in cand:
        tm = _pick_tile(M, mt, 16)        # bf16 rows: align 16 (sublane pack)
        tn = _pick_tile(Nout, nt, 128)
        tk = K if K <= kt else _pick_tile(K, kt, 128)
        ws = (2 * tm * tk * 2            # x tile, bf16, double-buffered
              + 2 * tk * tn * 2          # w tile, bf16, double-buffered
              + 2 * tm * tn * out_itemsize   # out tile, double-buffered
              + tm * tn * 4              # f32 accumulator
              + 2 * tn * 4)              # bias
        if ws <= budget:
            break
    return tm, tn, tk


def _attn_q_tile(N, C, heads, budget):
    """Largest tq (target 256, 16-aligned) whose per-step working set fits."""
    kv_bytes = 2 * (2 * N * C * 2)                   # K + V bf16, double-buffered
    tq = None
    for target in (256, 128, 64, 32, 16, 8):
        tq = _pick_tile(N, target, 16)
        per_q = (2 * (tq * C * 2) * 2                # q + o blocks, bf16, dbl-buf
                 + 2 * (heads * tq * N * 2)          # attn block, bf16, dbl-buf
                 + tq * C * 4)                       # f32 output scratch
        if kv_bytes + per_q <= budget:
            break
    return tq


# ----------------------------------------------------------------------------
# Kernel 1: stacked dense layer  out[s] = x @ W[s] + b[s]
#   x: (M, K) bf16, W: (S, K, Nout) bf16, b: (S, 1, Nout) f32
# Grid (M//tm, Nout//tn, S, K//tk): M leads the parallel axes (megacore
# balance), K is the innermost reduction with an f32 VMEM accumulator.
# ----------------------------------------------------------------------------
def _stacked_linear_kernel(x_ref, w_ref, b_ref, o_ref, acc_ref):
    k = pl.program_id(3)

    @pl.when(k == 0)
    def _():
        acc_ref[...] = jnp.zeros_like(acc_ref)

    acc_ref[...] += jnp.dot(
        x_ref[...], w_ref[...], preferred_element_type=jnp.float32
    )

    @pl.when(k == pl.num_programs(3) - 1)
    def _():
        o_ref[...] = (acc_ref[...] + b_ref[...]).astype(o_ref.dtype)


def stacked_linear(x2d, w_stack, b_stack, out_dtype):
    """x2d: (M, K) bf16, w_stack: (S, K, Nout) bf16, b_stack: (S, 1, Nout) f32."""
    M, K = x2d.shape
    S, K2, Nout = w_stack.shape
    assert K2 == K
    out_itemsize = jnp.dtype(out_dtype).itemsize
    tm, tn, tk = _linear_tiles(M, K, Nout, out_itemsize, _LINEAR_VMEM_LIMIT)
    grid = (M // tm, Nout // tn, S, K // tk)

    cost = pl.CostEstimate(
        flops=2 * S * M * Nout * K,
        transcendentals=0,
        bytes_accessed=int(
            M * K * x2d.dtype.itemsize
            + w_stack.size * w_stack.dtype.itemsize
            + b_stack.size * b_stack.dtype.itemsize
            + S * M * Nout * out_itemsize
        ),
    )

    return pl.pallas_call(
        _stacked_linear_kernel,
        out_shape=jax.ShapeDtypeStruct((S, M, Nout), out_dtype),
        grid_spec=pltpu.PrefetchScalarGridSpec(
            num_scalar_prefetch=0,
            grid=grid,
            in_specs=[
                pl.BlockSpec((tm, tk), lambda i, j, s, k: (i, k)),
                pl.BlockSpec((pl.Squeezed(), tk, tn), lambda i, j, s, k: (s, k, j)),
                pl.BlockSpec((pl.Squeezed(), 1, tn), lambda i, j, s, k: (s, 0, j)),
            ],
            out_specs=pl.BlockSpec(
                (pl.Squeezed(), tm, tn), lambda i, j, s, k: (s, i, j)
            ),
            scratch_shapes=[pltpu.VMEM((tm, tn), jnp.float32)],
        ),
        compiler_params=pltpu.CompilerParams(
            dimension_semantics=("parallel", "parallel", "arbitrary", "arbitrary"),
            vmem_limit_bytes=_LINEAR_VMEM_LIMIT,
        ),
        cost_estimate=cost,
    )(x2d, w_stack, b_stack)


# ----------------------------------------------------------------------------
# Kernel 2: attention.  Grid (B, N//tq); each step handles one query tile of
# all heads (static unroll -> free static ref views).  q/k/v come straight
# from the fused (3, B, N, C) qkv tensor (scale already folded into q).
# Softmax path in bf16 (row max/sum reductions in f32); attn stored bf16.
# Per-head outputs accumulate into a (tq, C) f32 scratch so the merged-head
# output gets ONE lane-dense (tq, C) store per tile.
# ----------------------------------------------------------------------------
def _attn_kernel(q_ref, k_ref, v_ref, o_ref, attn_ref, o_acc_ref, *, heads):
    # q_ref: (tq, C) bf16   k_ref, v_ref: (N, C) bf16
    # o_ref: (tq, C) bf16   attn_ref: (heads, tq, N) bf16
    # o_acc_ref: (tq, C) f32 scratch
    C = q_ref.shape[-1]
    hd = C // heads
    for h in range(heads):  # static unroll; slices are zero-cost ref views
        lo = h * hd
        qh = q_ref[:, lo:lo + hd]            # (tq, hd) bf16, scale pre-folded
        kh = k_ref[:, lo:lo + hd]            # (N, hd)  bf16
        vh = v_ref[:, lo:lo + hd]            # (N, hd)  bf16

        # scores: contract last dims directly (no explicit k transpose)
        s = lax.dot_general(
            qh, kh, (((1,), (1,)), ((), ())),
            preferred_element_type=jnp.float32,
        )                                    # (tq, N) f32

        m = jnp.max(s, axis=-1, keepdims=True)                     # f32 reduce
        p = jnp.exp((s - m).astype(jnp.bfloat16))                  # bf16 EUP exp
        l = jnp.sum(p, axis=-1, keepdims=True, dtype=jnp.float32)  # f32 reduce
        r = pl.reciprocal(l, approx=True).astype(jnp.bfloat16)
        p = p * r                                                  # bf16 probs

        attn_ref[h] = p                      # bf16 attention probs (returned)

        # per-head contribution into the f32 merge scratch (small VMEM write)
        o_acc_ref[:, lo:lo + hd] = jnp.dot(
            p, vh, preferred_element_type=jnp.float32
        )

    # single full-width, lane-dense store of the merged-head output tile
    o_ref[...] = o_acc_ref[...].astype(o_ref.dtype)


def mha_core(qkv, heads):
    """qkv: (3, B, N, C) bf16 -> (out (B, N, C) bf16, attn (B, H, N, N) bf16)."""
    _, B, N, C = qkv.shape
    hd = C // heads
    tq = _attn_q_tile(N, C, heads, int(_ATTN_VMEM_LIMIT * 0.9))
    grid = (B, N // tq)

    q_spec = pl.BlockSpec(
        (pl.Squeezed(), pl.Squeezed(), tq, C), lambda b, qi: (0, b, qi, 0)
    )
    k_spec = pl.BlockSpec(
        (pl.Squeezed(), pl.Squeezed(), N, C), lambda b, qi: (1, b, 0, 0)
    )
    v_spec = pl.BlockSpec(
        (pl.Squeezed(), pl.Squeezed(), N, C), lambda b, qi: (2, b, 0, 0)
    )
    o_spec = pl.BlockSpec((pl.Squeezed(), tq, C), lambda b, qi: (b, qi, 0))
    a_spec = pl.BlockSpec(
        (pl.Squeezed(), heads, tq, N), lambda b, qi: (b, 0, qi, 0)
    )

    cost = pl.CostEstimate(
        flops=4 * B * heads * N * N * hd,
        transcendentals=B * heads * N * N,
        bytes_accessed=int(
            3 * B * N * C * 2 + B * N * C * 2 + B * heads * N * N * 2
        ),
    )

    return pl.pallas_call(
        functools.partial(_attn_kernel, heads=heads),
        out_shape=(
            jax.ShapeDtypeStruct((B, N, C), jnp.bfloat16),
            jax.ShapeDtypeStruct((B, heads, N, N), jnp.bfloat16),
        ),
        grid_spec=pltpu.PrefetchScalarGridSpec(
            num_scalar_prefetch=0,
            grid=grid,
            in_specs=[q_spec, k_spec, v_spec],
            out_specs=[o_spec, a_spec],
            scratch_shapes=[pltpu.VMEM((tq, C), jnp.float32)],
        ),
        compiler_params=pltpu.CompilerParams(
            dimension_semantics=("parallel", "parallel"),
            vmem_limit_bytes=_ATTN_VMEM_LIMIT,
        ),
        cost_estimate=cost,
    )(qkv, qkv, qkv)


# ----------------------------------------------------------------------------
# Module wrapper
# ----------------------------------------------------------------------------
class AttentionPallas:
    def __init__(self, dim, heads, dropout, key):
        self.heads = heads
        self.dim = dim
        head_dim = dim // heads
        self.scale = head_dim ** (-0.5)

        # Reference (f32, PyTorch-layout) parameters.
        k1, k2, k3, k4 = jax.random.split(key, 4)
        bound = 1.0 / math.sqrt(dim)
        self.w_qkv = jax.random.uniform(k1, (dim * 3, dim), jnp.float32, -bound, bound)
        self.b_qkv = jax.random.uniform(k2, (dim * 3,), jnp.float32, -bound, bound)
        self.w_proj = jax.random.uniform(k3, (dim, dim), jnp.float32, -bound, bound)
        self.b_proj = jax.random.uniform(k4, (dim,), jnp.float32, -bound, bound)

        # Kernel parameters: pre-transposed, stacked, bf16, scale folded into
        # the q section -- all done ONCE here (no per-call w.T / reshape).
        scale_vec = jnp.array([self.scale, 1.0, 1.0], jnp.float32).reshape(3, 1, 1)
        w_qkv_t = jnp.swapaxes(self.w_qkv.reshape(3, dim, dim), 1, 2)  # (3, K, C)
        self.w_qkv_k = (w_qkv_t * scale_vec).astype(jnp.bfloat16)
        self.b_qkv_k = (self.b_qkv.reshape(3, 1, dim) * scale_vec).astype(jnp.float32)
        self.w_proj_k = self.w_proj.T.reshape(1, dim, dim).astype(jnp.bfloat16)
        self.b_proj_k = self.b_proj.reshape(1, 1, dim).astype(jnp.float32)

    def __call__(self, x):
        B, N, C = x.shape
        H = self.heads

        # fused qkv projection -> (3, B*N, C) bf16 (scale already in q weights)
        x2d = x.reshape(B * N, C).astype(jnp.bfloat16)
        qkv = stacked_linear(x2d, self.w_qkv_k, self.b_qkv_k, jnp.bfloat16)
        qkv = qkv.reshape(3, B, N, C)                  # free reshape, no permute

        # attention: merged-head output (B, N, C) bf16 + attn (B, H, N, N) bf16
        out, attn = mha_core(qkv, heads=H)

        # output projection -> f32
        y = stacked_linear(
            out.reshape(B * N, C), self.w_proj_k, self.b_proj_k, jnp.float32
        )
        return y.reshape(B, N, C), attn


# ----------------------------------------------------------------------------
# Pure-JAX f32 reference for validation
# ----------------------------------------------------------------------------
def reference(mod, x):
    B, N, C = x.shape
    H, hd = mod.heads, C // mod.heads
    qkv = x.reshape(B * N, C) @ mod.w_qkv.T + mod.b_qkv
    qkv = qkv.reshape(B, N, 3, H, hd).transpose(2, 0, 3, 1, 4)
    q, k, v = qkv[0], qkv[1], qkv[2]
    s = jnp.einsum("bhqd,bhkd->bhqk", q, k) * mod.scale
    attn = jax.nn.softmax(s, axis=-1)
    out = jnp.einsum("bhqk,bhkd->bhqd", attn, v)
    out = out.transpose(0, 2, 1, 3).reshape(B * N, C)
    out = (out @ mod.w_proj.T + mod.b_proj).reshape(B, N, C)
    return out, attn


if __name__ == "__main__":
    B, N, C, heads = 2, 8, 32, 4
    key = jax.random.PRNGKey(0)
    kx, kp = jax.random.split(key)
    x = jax.random.normal(kx, (B, N, C), jnp.float32)

    mod = AttentionPallas(dim=C, heads=heads, dropout=0.0, key=kp)

    out, attn = mod(x)
    out = jax.block_until_ready(out)
    attn = jax.block_until_ready(attn)

    out_ref, attn_ref = reference(mod, x)
    # bf16 MXU inputs / bf16 softmax + approx reciprocal -> relaxed tolerances
    assert out.shape == (B, N, C) and attn.shape == (B, heads, N, N)
    assert jnp.allclose(out, out_ref, atol=5e-2, rtol=5e-2), (
        "out mismatch, max abs diff %e" % float(jnp.max(jnp.abs(out - out_ref)))
    )
    assert jnp.allclose(attn.astype(jnp.float32), attn_ref, atol=3e-2, rtol=0.0), (
        "attn mismatch, max abs diff %e"
        % float(jnp.max(jnp.abs(attn.astype(jnp.float32) - attn_ref)))
    )

    print("KERNEL_OK")
</pallas_src>

<mosaic_0001>
module attributes {stable_mosaic.version = 11 : i64} {
  func.func @_stacked_linear_kernel(%arg0: i32, %arg1: i32, %arg2: i32, %arg3: i32, %arg4: memref<16x32xbf16, #tpu.memory_space<vmem>>, %arg5: memref<1x32x32xbf16, #tpu.memory_space<vmem>>, %arg6: memref<1x1x32xf32, #tpu.memory_space<vmem>>, %arg7: memref<1x16x32xbf16, #tpu.memory_space<vmem>>, %arg8: memref<16x32xf32, #tpu.memory_space<vmem>>) attributes {dimension_semantics = [#tpu.dimension_semantics<parallel>, #tpu.dimension_semantics<parallel>, #tpu.dimension_semantics<arbitrary>, #tpu.dimension_semantics<arbitrary>], iteration_bounds = array<i64: 1, 1, 3, 1>, scalar_prefetch = 0 : i64, scratch_operands = 1 : i64, tpu.core_type = #tpu.core_type<tc>, window_params = [{transform_indices = @transform_0, window_bounds = array<i64: 16, 32>}, {transform_indices = @transform_1, window_bounds = array<i64: 1, 32, 32>}, {transform_indices = @transform_2, window_bounds = array<i64: 1, 1, 32>}, {transform_indices = @transform_3, window_bounds = array<i64: 1, 16, 32>}]} {
    %c0_i32 = arith.constant 0 : i32
    %0 = arith.cmpi eq, %arg3, %c0_i32 : i32
    %1 = arith.extui %0 : i1 to i32
    %c0_i32_0 = arith.constant 0 : i32
    %2 = arith.cmpi ne, %1, %c0_i32_0 : i32
    scf.if %2 {
      %cst_11 = arith.constant 0.000000e+00 : f32
      %13 = vector.broadcast %cst_11 : f32 to vector<16x32xf32>
      %c0_12 = arith.constant 0 : index
      %c0_13 = arith.constant 0 : index
      %14 = vector.load %arg8[%c0_12, %c0_13] : memref<16x32xf32, #tpu.memory_space<vmem>>, vector<16x32xf32>
      tpu.vector_store %arg8[%c0_12, %c0_13], %13 {strides = array<i32>} : memref<16x32xf32, #tpu.memory_space<vmem>>, vector<16x32xf32>,
    } else {
    }
    %c0 = arith.constant 0 : index
    %c0_1 = arith.constant 0 : index
    %3 = vector.load %arg8[%c0, %c0_1] : memref<16x32xf32, #tpu.memory_space<vmem>>, vector<16x32xf32>
    %c0_2 = arith.constant 0 : index
    %c0_3 = arith.constant 0 : index
    %4 = vector.load %arg4[%c0_2, %c0_3] : memref<16x32xbf16, #tpu.memory_space<vmem>>, vector<16x32xbf16>
    %c0_4 = arith.constant 0 : index
    %c0_5 = arith.constant 0 : index
    %c0_6 = arith.constant 0 : index
    %5 = vector.load %arg5[%c0_4, %c0_5, %c0_6] : memref<1x32x32xbf16, #tpu.memory_space<vmem>>, vector<1x32x32xbf16>
    %6 = vector.shape_cast %5 : vector<1x32x32xbf16> to vector<32x32xbf16>
    %cst = arith.constant dense<0.000000e+00> : vector<16x32xf32>
    %7 = tpu.matmul %4, %6, %cst {dimension_numbers = #tpu.dot_dimension_numbers<[1], [0], [0], [1], [0, 0, 1, 1], [], []>} : vector<16x32xbf16>, vector<32x32xbf16>, vector<16x32xf32> -> vector<16x32xf32>
    %8 = arith.addf %3, %7 : vector<16x32xf32>
    %c0_7 = arith.constant 0 : index
    %c0_8 = arith.constant 0 : index
    %9 = vector.load %arg8[%c0_7, %c0_8] : memref<16x32xf32, #tpu.memory_space<vmem>>, vector<16x32xf32>
    tpu.vector_store %arg8[%c0_7, %c0_8], %8 {strides = array<i32>} : memref<16x32xf32, #tpu.memory_space<vmem>>, vector<16x32xf32>,
    %c0_i32_9 = arith.constant 0 : i32
    %10 = arith.cmpi eq, %arg3, %c0_i32_9 : i32
    %11 = arith.extui %10 : i1 to i32
    %c0_i32_10 = arith.constant 0 : i32
    %12 = arith.cmpi ne, %11, %c0_i32_10 : i32
    scf.if %12 {
      %c0_11 = arith.constant 0 : index
      %c0_12 = arith.constant 0 : index
      %13 = vector.load %arg8[%c0_11, %c0_12] : memref<16x32xf32, #tpu.memory_space<vmem>>, vector<16x32xf32>
      %c0_13 = arith.constant 0 : index
      %c0_14 = arith.constant 0 : index
      %c0_15 = arith.constant 0 : index
      %14 = vector.load %arg6[%c0_13, %c0_14, %c0_15] : memref<1x1x32xf32, #tpu.memory_space<vmem>>, vector<1x1x32xf32>
      %15 = vector.shape_cast %14 : vector<1x1x32xf32> to vector<1x32xf32>
      %16 = vector.broadcast %15 : vector<1x32xf32> to vector<16x32xf32>
      %17 = arith.addf %13, %16 : vector<16x32xf32>
      %18 = arith.truncf %17 : vector<16x32xf32> to vector<16x32xbf16>
      %c0_16 = arith.constant 0 : index
      %c0_17 = arith.constant 0 : index
      %c0_18 = arith.constant 0 : index
      %19 = vector.load %arg7[%c0_16, %c0_17, %c0_18] : memref<1x16x32xbf16, #tpu.memory_space<vmem>>, vector<1x16x32xbf16>
      %20 = vector.shape_cast %19 : vector<1x16x32xbf16> to vector<16x32xbf16>
      %21 = vector.shape_cast %18 : vector<16x32xbf16> to vector<1x16x32xbf16>
      tpu.vector_store %arg7[%c0_16, %c0_17, %c0_18], %21 {strides = array<i32>} : memref<1x16x32xbf16, #tpu.memory_space<vmem>>, vector<1x16x32xbf16>,
    } else {
    }
    return
  }
  func.func @transform_0(%arg0: i32, %arg1: i32, %arg2: i32, %arg3: i32) -> (i32, i32) {
    %c0_i32 = arith.constant 0 : i32
    return %arg0, %arg3 : i32, i32
  }
  func.func @transform_1(%arg0: i32, %arg1: i32, %arg2: i32, %arg3: i32) -> (i32, i32, i32) {
    %c0_i32 = arith.constant 0 : i32
    return %arg2, %arg3, %arg1 : i32, i32, i32
  }
  func.func @transform_2(%arg0: i32, %arg1: i32, %arg2: i32, %arg3: i32) -> (i32, i32, i32) {
    %c0_i32 = arith.constant 0 : i32
    %c0_i32_0 = arith.constant 0 : i32
    return %arg2, %c0_i32, %arg1 : i32, i32, i32
  }
  func.func @transform_3(%arg0: i32, %arg1: i32, %arg2: i32, %arg3: i32) -> (i32, i32, i32) {
    %c0_i32 = arith.constant 0 : i32
    return %arg2, %arg0, %arg1 : i32, i32, i32
  }
}

</mosaic_0001>

<bundles_post_ra>
// kernel: tpu_custom_call.1
= control target key start
LH: loop header
LB: loop body
LE: loop exit
PB: predicated region body
PF: predicated region fallthrough
CT: control target
= control target key end

     0   :  { %8 = vsyncpa [#allocation4], 0  ;;  %s1016_s0 = inlined_call_operand.hbm [shape: bf16[16,32], index: 0, kind: input, shape index: {}]   ;;  %s1017_s1 = inlined_call_operand.hbm [shape: bf16[3,32,32], index: 1, kind: input, shape index: {}]   ;;  %s1018_s2 = inlined_call_operand.hbm [shape: f32[3,1,32], index: 2, kind: input, shape index: {}]   ;;  %s1019_s3 = inlined_call_operand.hbm [shape: bf16[3,16,32], index: 3, kind: output, shape index: {}]  }
   0x1   :  { %9 = vsyncpa [#allocation7], 0 }
   0x2   :  { %11 = vsyncpa [#allocation7 + $0x1], 0 }
   0x3   :  { %12 = vsyncpa [#allocation5], 0 }
   0x4   :  { %14 = vsyncpa [#allocation5 + $0x1], 0  ;;  %s835_s12 = smov 0   ;;  %s837_s13 = smov 0  }
   0x5   :  { %s839_s14 = smov 0   ;;  %s841_s15 = smov 0  }
   0x6   :  { %s843_s16 = smov 0   ;;  %s845_s17 = smov 0  }
   0x7 LB: > { %s38_s18 = sadd.s32 1, %s803_s16  ;;  %s85_s19 = sadd.s32 1, %s795_s14  ;;  %s807_s17 = sphi %s845_s17, %s20_s17   ;;  %s803_s16 = sphi %s843_s16, %s1030_s16   ;;  %s799_s15 = sphi %s841_s15, %s1029_s15   ;;  %s795_s14 = sphi %s839_s14, %s1028_s14   ;;  %s791_s13 = sphi %s837_s13, %s1027_s13   ;;  %s787_s12 = sphi %s835_s12, %s1026_s12  }
   0x8   : > { %p40_p0 = scmp.ge.s32.totalorder %s38_s18, 3  ;;  %p92_p1 = scmp.ne.s32.totalorder %s795_s14, %s791_s13 }
   0x9   : > { %p93_p2 = scmp.eq.s32.totalorder %s807_s17, 0  ;;  %p573_p5 = scmp.lt.s32.totalorder %s807_s17, 3 }
   0xa   : > { %s1032_s18 = smov (%p40_p0, %s38_s18), 0  ;;  %s198_s22 = sand.u32 1, %s807_s17  }
   0xb   : > { %p875_p3 = por %p93_p2, %p92_p1  ;;  %s78_s21 = ssub.s32 %s803_s16, %s1032_s18 }
   0xc   : > { %p83_p4 = scmp.eq.s32.totalorder %s78_s21, 0  ;;  %s200_s23 = sand.u32 1, %s795_s14  }
   0xd   : > { %s517_s25 = sshll.u32 %s200_s23, 4  ;;  %s542_s26 = sshll.u32 %s803_s16, 4 }
   0xe   : > { %s885_s24 = scalar_select %p83_p4, %s795_s14, %s85_s19  }
   0xf   : > { %s210_s29 = scalar_lea.hbm %s1017_s1, %s542_s26  ;;  %s202_s30 = scalar_lea.vmem [#allocation6], %s517_s25 }
  0x10   : > { %s213_s4 = sshll.u32 %s202_s30, 4  ;;  %s211_s5 = sshll.u32 %s210_s29, 4  ;;  %s214_s4 = int_to_ptr.vmem [resolvable:$true] %s213_s4  ;;  %s212_s5 = int_to_ptr.hbm [resolvable:$true] %s211_s5 }
  0x11   : > { %p895_p6 = pnand %p573_p5, %p875_p3  ;;  %s899_s7 = scalar_lea.sflag [#allocation7], %s198_s22 }
  0x12   : > { %s809_s8 = smov 64   ;;  %s810_s9 = smov 4  }
  0x13   : > { %564 = dma.hbm_to_vmem [thread:$0]  (!%p895_p6), %s212_s5, 256, %s214_s4, %s899_s7, %s809_s8, %s809_s8, %s810_s9  }
  0x14   : > { %s908_s10 = sadd.s32 4294967295, %s807_s17   ;;  %s513_s11 = sadd.s32 4294967294, %s807_s17  }
  0x15   : > { %p98_p7 = scmp.ne.s32.totalorder %s791_s13, %s787_s12  ;;  %p99_p8 = scmp.eq.s32.totalorder %s908_s10, 0 }
  0x16   : > { %p154_p9 = scmp.eq.s32.totalorder %s908_s10, 2  ;;  %p160_p10 = scmp.eq.s32.totalorder %s513_s11, 2 }
  0x17   : > { %p514_p11 = scmp.ge.s32.totalorder %s807_s17, 1  ;;  %p918_p12 = por %p99_p8, %p98_p7 }
  0x18   : > { %p925_p13 = por %p154_p9, %p92_p1  ;;  %p929_p0 = por %p160_p10, %p98_p7 }
  0x19   : > { %p167_p2 = scmp.lt.s32.totalorder %s807_s17, 4  ;;  %s182_s26 = sshll.u32 %s1016_s0, 4  ;;  %s183_s26 = int_to_ptr.hbm [resolvable:$true] %s182_s26 }
  0x1a   : > { %s811_s28 = smov [#allocation3]   ;;  %s230_s5 = scalar_lea.hbm %s1018_s2, %s803_s16 }
  0x1b   : > { %p937_p3 = pnand %p514_p11, %p167_p2  ;;  %s184_s29 = sshll.u32 %s811_s28, 4  ;;  %s185_s29 = int_to_ptr.vmem [resolvable:$true] %s184_s29 }
  0x1c   : > { %s232_s11 = sshll.u32 %s230_s5, 4  ;;  %s226_s22 = scalar_lea.vmem [#allocation8], %s200_s23  ;;  %s233_s11 = int_to_ptr.hbm [resolvable:$true] %s232_s11 }
  0x1d   : > { %p557_p1 = pneg %p937_p3  ;;  %s234_s25 = sshll.u32 %s226_s22, 4  ;;  %s235_s25 = int_to_ptr.vmem [resolvable:$true] %s234_s25 }
  0x1e   : > { %567 = dma.hbm_to_vmem [thread:$0]  (!%p895_p6), %s233_s11, 16, %s235_s25, %s899_s7  }
  0x1f   : > { %p558_p4 = pnand %p557_p1, %p99_p8  ;;  %243 = sbr.rel (%p937_p3) target bundleno = 201 (0xc9), region = 32 }
  0x21   : > { %560 = dma.hbm_to_vmem [thread:$0]  (!%p558_p4), %s183_s26, 128, %s185_s29, [#allocation4], %s809_s8, %s809_s8, %s810_s9  }
  0x24   : > { %774 = dma.done.wait (%p99_p8), [#allocation4], 128  }
  0x25   : > { %776 = vsyncadd (%p99_p8), [#allocation4], 4294967168  ;;  %s250_s23 = sand.u32 1, %s908_s10   ;;  %s965_s28 = sand.u32 1, %s791_s13  }
  0x26   : > { %s522_s30 = sshll.u32 %s965_s28, 4  ;;  %s251_s8 = scalar_lea.sflag [#allocation7], %s250_s23 }
  0x27   : > { %s254_s6 = scalar_lea.vmem [#allocation6], %s522_s30 }
  0x28   : > { %778 = dma.done.wait (%p918_p12), %s251_s8, 272  }
  0x29   : > { %780 = vsyncadd (%p918_p12), %s251_s8, 4294967024  ;;  %vm299_vm0 = vcmask 261120   ;;  %v812_v0 = vmov 0.0   ;;  %v545_v1 = vld [vmem:[%s254_s6 + $0x8] sm:$0xff]  ;;  %v544_v2 = vld [vmem:[%s254_s6] sm:$0xff]  ;;  %s263_s7 = scalar_lea.vmem [#allocation8], %s965_s28 }
  0x2a   : > { %300 = vst.msk [vmem:[#allocation2] sm:$0xff] %vm299_vm0, %v812_v0  ;;  %337 = vmatpush.bf16.msra.mxu0 %v545_v1  ;;  %v543_v3 = vld [vmem:[#allocation3] sm:$0xff]  ;;  %v630_v8 = vld [vmem:[%s263_s7] ss:$0 sm:$0xff]  ;;  %s523_s9 = sshll.u32 %s965_s28, 3  ;;  %s546_s10 = sshll.u32 %s799_s15, 3 }
  0x2b   : > { %301 = vst.msk [vmem:[#allocation2 + $0x8] sm:$0xff] %vm299_vm0, %v812_v0  ;;  %vm362_vm1 = vcmask 257024   ;;  %s380_s27 = scalar_lea.hbm %s1019_s3, %s546_s10  ;;  %s290_s29 = scalar_lea.vmem [#allocation9], %s523_s9 }
  0x2c   : > { %s381_s4 = sshll.u32 %s290_s29, 4  ;;  %s383_s5 = sshll.u32 %s380_s27, 4  ;;  %s382_s4 = int_to_ptr.vmem [resolvable:$true] %s381_s4  ;;  %s384_s5 = int_to_ptr.hbm [resolvable:$true] %s383_s5 }
  0x2d   : > { %s366_s11 = scalar_lea.sflag [#allocation5], %s965_s28  ;;  %s735_s22 = sshra.s32 %s384_s5, 4  ;;  %s736_s22 = int_to_ptr.hbm [resolvable:$true] %s735_s22 }
  0x2e   : > { %338 = vmatpush.bf16.msra.mxu0 %v544_v2  ;;  %s737_s15 = scalar_lea.hbm %s736_s22, 8  ;;  %s741_s30 = scalar_lea.hbm %s1019_s3, 24 }
  0x2f   : > { %p738_p5 = scmp.ne.s32.totalorder %s736_s22, %s737_s15  ;;  %p742_p8 = scmp.lt.s32.totalorder %s736_s22, %s1019_s3 }
  0x30   : > { %p743_p9 = scmp.lt.s32.totalorder %s741_s30, %s737_s15 }
  0x31   : > { %536 = vmatmul.msk.bf16.vlgmr.msra.gmra.mxu0 %vm299_vm0, %v543_v3  ;;  %v302_v4 = vld [vmem:[#allocation2] sm:$0xff]  ;;  %p739_p6 = pnand %p738_p5, %p925_p13 }
  0x32   : > { %v303_v7 = vld [vmem:[#allocation2 + $0x8] sm:$0xff]  ;;  %p744_p10 = por %p743_p9, %p742_p8 }
  0x33   : > { %p740_p7 = pneg %p739_p6 }
  0x35   : > { %p745_p11 = pnand %p744_p10, %p740_p7 }
  0xae   : > { %v340_v5 = vpop.f32.mrf.mxu0 }
  0xaf   : > { %v345_v6 = vadd.f32 %v340_v5, %v302_v4 }
  0xb1   : > { %347 = vst.msk [vmem:[#allocation2] sm:$0xff] %vm299_vm0, %v345_v6 }
  0xb6   : > { %v342_v9 = vpop.f32.mrf.mxu0 }
  0xb7   : > { %v346_v10 = vadd.f32 %v342_v9, %v303_v7 }
  0xb8   : > { %v352_v11 = vld [vmem:[#allocation2] sm:$0xff] }
  0xb9   : > { %348 = vst.msk [vmem:[#allocation2 + $0x8] sm:$0xff] %vm299_vm0, %v346_v10  ;;  %v358_v12 = vadd.f32 %v630_v8, %v352_v11 }
  0xbb   : > { %v360_v13 = vpack.c.bf16 %v358_v12, %v358_v12 }
  0xbd   : > { %363 = vst.msk [vmem:[%s290_s29] sm:$0xf] %vm362_vm1, %v360_v13 }
  0xc0   : > { %v353_v14 = vld [vmem:[#allocation2 + $0x8] sm:$0xff] }
  0xc1   : > { %v359_v15 = vadd.f32 %v630_v8, %v353_v14 }
  0xc3   : > { %v361_v16 = vpack.c.bf16 %v359_v15, %v359_v15 }
  0xc5   : > { %364 = vst.msk [vmem:[%s290_s29 + $0x4] sm:$0xf] %vm362_vm1, %v361_v16 }
  0xc6   : > { %748 = shalt.err (!%p745_p11)
}
  0xc7   : > { %s813_s28 = smov 64   ;;  %s814_s7 = smov 4  }
  0xc8   : > { %555 = dma.vmem_to_hbm [thread:$0]  (%p925_p13), %s382_s4, 128, %s384_s5, %s366_s11, %s813_s28, %s813_s28, %s814_s7  }
  0xc9 PF: > { %p575_p12 = scmp.ge.s32.totalorder %s807_s17, 2  ;;  %s398_s9 = sand.u32 1, %s787_s12  }
  0xca   : > { %s399_s10 = scalar_lea.sflag [#allocation5], %s398_s9 }
  0xcb   : > { %p569_p2 = pnand %p575_p12, %p929_p0 }
  0xcd   : > { %p570_p3 = pneg %p569_p2 }
  0xcf   : > { %782 = dma.done.wait (%p570_p3), %s399_s10, 128  }
  0xd0   : > { %784 = vsyncadd (%p570_p3), %s399_s10, 4294967168  ;;  %s20_s17 = sadd.s32 1, %s807_s17   ;;  %s1026_s12 = smov %s791_s13 }
  0xd1   : > { %p17_p1 = scmp.ge.s32.totalorder %s20_s17, 5   ;;  %s1027_s13 = smov %s795_s14 }
  0xd2   : > { %s1028_s14 = smov %s885_s24  ;;  %s1029_s15 = smov %s803_s16 }
  0xd3   : > { %s1030_s16 = smov %s1032_s18  ;;  %19 = sbr.rel (!%p17_p1) target bundleno = 7 (0x7), region = 102 }
  0xd8   :  { %405 = vsyncpa [#allocation4], 1 }
  0xd9   :  { %407 = vsyncpa [#allocation4 + $0x1], 1 }
  0xda   :  { %408 = vsyncpa [#allocation7], 1 }
  0xdb   :  { %410 = vsyncpa [#allocation7 + $0x1], 1 }
  0xdc   :  { %411 = vsyncpa [#allocation5], 1 }
  0xdd   :  { %413 = vsyncpa [#allocation5 + $0x1], 1 }

</bundles_post_ra>
